<compile_context>
chip_gen: v7x
topology: tpu7x:2x2x1
jax: 0.10.0
libtpu: 0.0.40
codegen_flags: <defaults>
</compile_context>

<pallas_src>
import math

import jax
import jax.numpy as jnp
from jax import lax
from jax.experimental import pallas as pl
from jax.experimental.pallas import tpu as pltpu

# d_k is a module-level global in the original PyTorch code (used by the demo).
D_K = 32


def _sdpa_kernel(q_ref, k_ref, v_ref, mask_ref, ctx_ref, attn_ref):
    # Per-grid-step block shapes:
    #   q_ref    : (hb, tq, dk)
    #   k_ref    : (hb, Lk, dk)
    #   v_ref    : (hb, Lk, dv)
    #   mask_ref : (hb, tq, Lk)  int8, nonzero == masked
    #   ctx_ref  : (hb, tq, dv)
    #   attn_ref : (hb, tq, Lk)
    dk = q_ref.shape[-1]

    # Fold the 1/sqrt(d_k) scale into the small Q tile (multiply) instead of
    # dividing the O(tq*Lk) scores matrix.  Keep the native dtype for the MXU.
    q = q_ref[...] * jnp.asarray(1.0 / math.sqrt(dk), dtype=q_ref.dtype)
    k = k_ref[...]

    # scores[h, i, j] = sum_d q[h, i, d] * k[h, j, d]
    # (contraction via dot_general dimension numbers; no K^T copy)
    scores = lax.dot_general(
        q, k,
        dimension_numbers=(((2,), (2,)), ((0,), (0,))),
        preferred_element_type=jnp.float32,
    )

    # scores.masked_fill_(attn_mask, -1e9)
    scores = jnp.where(mask_ref[...] != 0, jnp.float32(-1e9), scores)

    # Numerically stable softmax over the last dim.  Row-sum reciprocal goes
    # to the EUP; normalization becomes a broadcast multiply on the VPU.
    m = jnp.max(scores, axis=-1, keepdims=True)
    e = jnp.exp(scores - m)
    s = jnp.sum(e, axis=-1, keepdims=True)
    attn = e * pl.reciprocal(s, approx=True)

    attn_ref[...] = attn.astype(attn_ref.dtype)

    # context[h, i, e] = sum_j attn[h, i, j] * v[h, j, e]
    ctx = lax.dot_general(
        attn.astype(v_ref.dtype), v_ref[...],
        dimension_numbers=(((2,), (1,)), ((0,), (0,))),
        preferred_element_type=jnp.float32,
    )
    ctx_ref[...] = ctx.astype(ctx_ref.dtype)


def _step_vmem_bytes(hb, tq, lk, dk, dv, in_bytes, out_bytes):
    """Rough per-grid-step VMEM working set: double-buffered streams + f32 temps."""
    q = hb * tq * dk * in_bytes
    k = hb * lk * dk * in_bytes
    v = hb * lk * dv * in_bytes
    msk = hb * tq * lk * 1            # int8 mask
    att = hb * tq * lk * out_bytes
    ctx = hb * tq * dv * out_bytes
    streams = 2 * (q + k + v + msk + att + ctx)   # pipeline double buffering
    temps = 2 * hb * tq * lk * 4                  # f32 scores / exp intermediates
    return streams + temps


def scaled_dot_product_attention(Q, K, V, attn_mask):
    """Q: [B,H,Lq,dk]  K: [B,H,Lk,dk]  V: [B,H,Lk,dv]  attn_mask: [B,H,Lq,Lk]."""
    B, H, Lq, dk = Q.shape
    _, _, Lk, dv = V.shape
    out_dtype = Q.dtype
    in_bytes = jnp.dtype(Q.dtype).itemsize
    out_bytes = jnp.dtype(out_dtype).itemsize

    # ---- tile selection -----------------------------------------------------
    # Lq tile: capped at 256 (v7x 64 MiB VMEM budget); candidates divide Lq
    # so the grid covers it exactly.  Fallback = full Lq.
    if Lq <= 256:
        tq = Lq
    else:
        tq = next((t for t in (256, 128, 64) if Lq % t == 0), Lq)

    # Heads per grid step: amortize the tiny dk=dv=32 matmuls and the per-step
    # overhead while keeping the working set under a v7x-safe budget.
    budget = 24 * 1024 * 1024
    hb = 1
    for cand in (16, 8, 4, 2, 1):
        if H % cand == 0 and _step_vmem_bytes(
            cand, tq, Lk, dk, dv, in_bytes, out_bytes
        ) <= budget:
            hb = cand
            break

    est = _step_vmem_bytes(hb, tq, Lk, dk, dv, in_bytes, out_bytes)
    vmem_limit = int(min(max(2 * est, 16 * 1024 * 1024), 48 * 1024 * 1024))

    # int8 mask (0 = keep, nonzero = masked): 4x less HBM traffic than int32.
    mask_i8 = attn_mask if attn_mask.dtype == jnp.int8 else attn_mask.astype(jnp.int8)

    sq = pl.Squeezed()
    grid = (B, H // hb, Lq // tq)

    ctx, attn = pl.pallas_call(
        _sdpa_kernel,
        out_shape=(
            jax.ShapeDtypeStruct((B, H, Lq, dv), out_dtype),
            jax.ShapeDtypeStruct((B, H, Lq, Lk), out_dtype),
        ),
        grid_spec=pltpu.PrefetchScalarGridSpec(
            num_scalar_prefetch=0,
            grid=grid,
            in_specs=[
                pl.BlockSpec((sq, hb, tq, dk), lambda b, h, q: (b, h, q, 0)),
                # K/V do not depend on the (innermost) Lq grid axis -> their
                # tiles stay resident and are reused across Lq steps.
                pl.BlockSpec((sq, hb, Lk, dk), lambda b, h, q: (b, h, 0, 0)),
                pl.BlockSpec((sq, hb, Lk, dv), lambda b, h, q: (b, h, 0, 0)),
                pl.BlockSpec((sq, hb, tq, Lk), lambda b, h, q: (b, h, q, 0)),
            ],
            out_specs=[
                pl.BlockSpec((sq, hb, tq, dv), lambda b, h, q: (b, h, q, 0)),
                pl.BlockSpec((sq, hb, tq, Lk), lambda b, h, q: (b, h, q, 0)),
            ],
        ),
        compiler_params=pltpu.CompilerParams(
            dimension_semantics=("parallel", "parallel", "parallel"),
            vmem_limit_bytes=vmem_limit,
        ),
    )(Q, K, V, mask_i8)
    return ctx, attn


if __name__ == "__main__":
    key = jax.random.PRNGKey(0)
    kq, kk, kv, km = jax.random.split(key, 4)

    B, H, Lq, Lk, d_v = 2, 2, 8, 8, 32
    Q = jax.random.normal(kq, (B, H, Lq, D_K), dtype=jnp.float32)
    K = jax.random.normal(kk, (B, H, Lk, D_K), dtype=jnp.float32)
    V = jax.random.normal(kv, (B, H, Lk, d_v), dtype=jnp.float32)
    attn_mask = jax.random.bernoulli(km, p=0.3, shape=(B, H, Lq, Lk))

    ctx, attn = scaled_dot_product_attention(Q, K, V, attn_mask)
    jax.block_until_ready((ctx, attn))

    # Pure-JAX reference check.  Tolerance 2e-3 because the kernel uses the
    # EUP approximate reciprocal for the softmax normalization.
    scores = jnp.einsum("bhqd,bhkd->bhqk", Q, K) / math.sqrt(D_K)
    scores = jnp.where(attn_mask, -1e9, scores)
    attn_ref = jax.nn.softmax(scores, axis=-1)
    ctx_ref = jnp.einsum("bhqk,bhkd->bhqd", attn_ref, V)
    assert jnp.allclose(attn, attn_ref, atol=2e-3, rtol=2e-3), "attn mismatch"
    assert jnp.allclose(ctx, ctx_ref, atol=2e-3, rtol=2e-3), "context mismatch"

    print("KERNEL_OK")
</pallas_src>

<mosaic_0001>
module attributes {stable_mosaic.version = 11 : i64} {
  func.func @_sdpa_kernel(%arg0: i32, %arg1: i32, %arg2: i32, %arg3: memref<1x2x8x32xf32, #tpu.memory_space<vmem>>, %arg4: memref<1x2x8x32xf32, #tpu.memory_space<vmem>>, %arg5: memref<1x2x8x32xf32, #tpu.memory_space<vmem>>, %arg6: memref<1x2x8x8xi8, #tpu.memory_space<vmem>>, %arg7: memref<1x2x8x32xf32, #tpu.memory_space<vmem>>, %arg8: memref<1x2x8x8xf32, #tpu.memory_space<vmem>>) attributes {dimension_semantics = [#tpu.dimension_semantics<parallel>, #tpu.dimension_semantics<parallel>, #tpu.dimension_semantics<parallel>], iteration_bounds = array<i64: 2, 1, 1>, scalar_prefetch = 0 : i64, scratch_operands = 0 : i64, tpu.core_type = #tpu.core_type<tc>, window_params = [{transform_indices = @transform_0, window_bounds = array<i64: 1, 2, 8, 32>}, {transform_indices = @transform_1, window_bounds = array<i64: 1, 2, 8, 32>}, {transform_indices = @transform_2, window_bounds = array<i64: 1, 2, 8, 32>}, {transform_indices = @transform_3, window_bounds = array<i64: 1, 2, 8, 8>}, {transform_indices = @transform_4, window_bounds = array<i64: 1, 2, 8, 32>}, {transform_indices = @transform_5, window_bounds = array<i64: 1, 2, 8, 8>}]} {
    %c0 = arith.constant 0 : index
    %c0_0 = arith.constant 0 : index
    %c0_1 = arith.constant 0 : index
    %c0_2 = arith.constant 0 : index
    %0 = vector.load %arg3[%c0, %c0_0, %c0_1, %c0_2] : memref<1x2x8x32xf32, #tpu.memory_space<vmem>>, vector<1x2x8x32xf32>
    %1 = vector.shape_cast %0 : vector<1x2x8x32xf32> to vector<2x8x32xf32>
    %cst = arith.constant 0.176776692 : f32
    %2 = vector.broadcast %cst : f32 to vector<2x8x32xf32>
    %3 = arith.mulf %1, %2 : vector<2x8x32xf32>
    %c0_3 = arith.constant 0 : index
    %c0_4 = arith.constant 0 : index
    %c0_5 = arith.constant 0 : index
    %c0_6 = arith.constant 0 : index
    %4 = vector.load %arg4[%c0_3, %c0_4, %c0_5, %c0_6] : memref<1x2x8x32xf32, #tpu.memory_space<vmem>>, vector<1x2x8x32xf32>
    %5 = vector.shape_cast %4 : vector<1x2x8x32xf32> to vector<2x8x32xf32>
    %cst_7 = arith.constant dense<0.000000e+00> : vector<2x8x8xf32>
    %6 = tpu.matmul %3, %5, %cst_7 {dimension_numbers = #tpu.dot_dimension_numbers<[2], [2], [1], [1], [0, 0, 0, 1, 1, 1], [0], [0]>} : vector<2x8x32xf32>, vector<2x8x32xf32>, vector<2x8x8xf32> -> vector<2x8x8xf32>
    %c0_8 = arith.constant 0 : index
    %c0_9 = arith.constant 0 : index
    %c0_10 = arith.constant 0 : index
    %c0_11 = arith.constant 0 : index
    %7 = vector.load %arg6[%c0_8, %c0_9, %c0_10, %c0_11] : memref<1x2x8x8xi8, #tpu.memory_space<vmem>>, vector<1x2x8x8xi8>
    %8 = vector.shape_cast %7 : vector<1x2x8x8xi8> to vector<2x8x8xi8>
    %c0_i8 = arith.constant 0 : i8
    %9 = vector.broadcast %c0_i8 : i8 to vector<2x8x8xi8>
    %10 = arith.cmpi ne, %8, %9 : vector<2x8x8xi8>
    %cst_12 = arith.constant -1.000000e+09 : f32
    %11 = vector.broadcast %cst_12 : f32 to vector<2x8x8xf32>
    %12 = arith.select %10, %11, %6 : vector<2x8x8xi1>, vector<2x8x8xf32>
    %cst_13 = arith.constant dense<0xFF800000> : vector<2x8xf32>
    %13 = vector.multi_reduction <maximumf>, %12, %cst_13 [2] : vector<2x8x8xf32> to vector<2x8xf32>
    %14 = vector.shape_cast %13 : vector<2x8xf32> to vector<2x8x1xf32>
    %15 = vector.broadcast %14 : vector<2x8x1xf32> to vector<2x8x8xf32>
    %16 = arith.subf %12, %15 : vector<2x8x8xf32>
    %17 = math.exp %16 : vector<2x8x8xf32>
    %cst_14 = arith.constant dense<0.000000e+00> : vector<2x8xf32>
    %18 = vector.multi_reduction <add>, %17, %cst_14 [2] : vector<2x8x8xf32> to vector<2x8xf32>
    %19 = vector.shape_cast %18 : vector<2x8xf32> to vector<2x8x1xf32>
    %20 = tpu.reciprocal %19 {approx = true} : vector<2x8x1xf32> -> vector<2x8x1xf32>
    %21 = vector.broadcast %20 : vector<2x8x1xf32> to vector<2x8x8xf32>
    %22 = arith.mulf %17, %21 : vector<2x8x8xf32>
    %c0_15 = arith.constant 0 : index
    %c0_16 = arith.constant 0 : index
    %c0_17 = arith.constant 0 : index
    %c0_18 = arith.constant 0 : index
    %23 = vector.load %arg8[%c0_15, %c0_16, %c0_17, %c0_18] : memref<1x2x8x8xf32, #tpu.memory_space<vmem>>, vector<1x2x8x8xf32>
    %24 = vector.shape_cast %23 : vector<1x2x8x8xf32> to vector<2x8x8xf32>
    %25 = vector.shape_cast %22 : vector<2x8x8xf32> to vector<1x2x8x8xf32>
    tpu.vector_store %arg8[%c0_15, %c0_16, %c0_17, %c0_18], %25 {strides = array<i32>} : memref<1x2x8x8xf32, #tpu.memory_space<vmem>>, vector<1x2x8x8xf32>,
    %c0_19 = arith.constant 0 : index
    %c0_20 = arith.constant 0 : index
    %c0_21 = arith.constant 0 : index
    %c0_22 = arith.constant 0 : index
    %26 = vector.load %arg5[%c0_19, %c0_20, %c0_21, %c0_22] : memref<1x2x8x32xf32, #tpu.memory_space<vmem>>, vector<1x2x8x32xf32>
    %27 = vector.shape_cast %26 : vector<1x2x8x32xf32> to vector<2x8x32xf32>
    %cst_23 = arith.constant dense<0.000000e+00> : vector<2x8x32xf32>
    %28 = tpu.matmul %22, %27, %cst_23 {dimension_numbers = #tpu.dot_dimension_numbers<[2], [1], [1], [2], [0, 0, 0, 1, 1, 2], [0], [0]>} : vector<2x8x8xf32>, vector<2x8x32xf32>, vector<2x8x32xf32> -> vector<2x8x32xf32>
    %c0_24 = arith.constant 0 : index
    %c0_25 = arith.constant 0 : index
    %c0_26 = arith.constant 0 : index
    %c0_27 = arith.constant 0 : index
    %29 = vector.load %arg7[%c0_24, %c0_25, %c0_26, %c0_27] : memref<1x2x8x32xf32, #tpu.memory_space<vmem>>, vector<1x2x8x32xf32>
    %30 = vector.shape_cast %29 : vector<1x2x8x32xf32> to vector<2x8x32xf32>
    %31 = vector.shape_cast %28 : vector<2x8x32xf32> to vector<1x2x8x32xf32>
    tpu.vector_store %arg7[%c0_24, %c0_25, %c0_26, %c0_27], %31 {strides = array<i32>} : memref<1x2x8x32xf32, #tpu.memory_space<vmem>>, vector<1x2x8x32xf32>,
    return
  }
  func.func @transform_0(%arg0: i32, %arg1: i32, %arg2: i32) -> (i32, i32, i32, i32) {
    %c0_i32 = arith.constant 0 : i32
    %c0_i32_0 = arith.constant 0 : i32
    return %arg0, %arg1, %arg2, %c0_i32 : i32, i32, i32, i32
  }
  func.func @transform_1(%arg0: i32, %arg1: i32, %arg2: i32) -> (i32, i32, i32, i32) {
    %c0_i32 = arith.constant 0 : i32
    %c0_i32_0 = arith.constant 0 : i32
    %c0_i32_1 = arith.constant 0 : i32
    return %arg0, %arg1, %c0_i32, %c0_i32_0 : i32, i32, i32, i32
  }
  func.func @transform_2(%arg0: i32, %arg1: i32, %arg2: i32) -> (i32, i32, i32, i32) {
    %c0_i32 = arith.constant 0 : i32
    %c0_i32_0 = arith.constant 0 : i32
    %c0_i32_1 = arith.constant 0 : i32
    return %arg0, %arg1, %c0_i32, %c0_i32_0 : i32, i32, i32, i32
  }
  func.func @transform_3(%arg0: i32, %arg1: i32, %arg2: i32) -> (i32, i32, i32, i32) {
    %c0_i32 = arith.constant 0 : i32
    %c0_i32_0 = arith.constant 0 : i32
    return %arg0, %arg1, %arg2, %c0_i32 : i32, i32, i32, i32
  }
  func.func @transform_4(%arg0: i32, %arg1: i32, %arg2: i32) -> (i32, i32, i32, i32) {
    %c0_i32 = arith.constant 0 : i32
    %c0_i32_0 = arith.constant 0 : i32
    return %arg0, %arg1, %arg2, %c0_i32 : i32, i32, i32, i32
  }
  func.func @transform_5(%arg0: i32, %arg1: i32, %arg2: i32) -> (i32, i32, i32, i32) {
    %c0_i32 = arith.constant 0 : i32
    %c0_i32_0 = arith.constant 0 : i32
    return %arg0, %arg1, %arg2, %c0_i32 : i32, i32, i32, i32
  }
}

</mosaic_0001>

<bundles_post_ra>
// kernel: tpu_custom_call.1
= control target key start
LH: loop header
LB: loop body
LE: loop exit
PB: predicated region body
PF: predicated region fallthrough
CT: control target
= control target key end

     0   :  { %s1774_s0 = inlined_call_operand.hbm [shape: f32[2,2,8,32], index: 0, kind: input, shape index: {}]   ;;  %s1775_s1 = inlined_call_operand.hbm [shape: f32[2,2,8,32], index: 1, kind: input, shape index: {}]   ;;  %s1776_s2 = inlined_call_operand.hbm [shape: f32[2,2,8,32], index: 2, kind: input, shape index: {}]   ;;  %s1777_s3 = inlined_call_operand.vmem [shape: s8[2,2,8,8], index: 3, kind: input, shape index: {}]   ;;  %s1778_s4 = inlined_call_operand.hbm [shape: f32[2,2,8,32], index: 4, kind: output, shape index: {0}]   ;;  %s1779_s5 = inlined_call_operand.hbm [shape: f32[2,2,8,8], index: 5, kind: output, shape index: {1}]  }
   0x1   :  { %1792 = sst [smem:[#allocation20_spill]] %s1775_s1 }
   0x2   :  { %11 = vsyncpa [#allocation3], 0 }
   0x3   :  { %13 = vsyncpa [#allocation3 + $0x1], 0 }
   0x4   :  { %14 = vsyncpa [#allocation6], 0 }
   0x5   :  { %16 = vsyncpa [#allocation6 + $0x1], 0 }
   0x6   :  { %17 = vsyncpa [#allocation4], 0 }
   0x7   :  { %19 = vsyncpa [#allocation4 + $0x1], 0 }
   0x8   :  { %20 = vsyncpa [#allocation10], 0 }
   0x9   :  { %22 = vsyncpa [#allocation10 + $0x1], 0  ;;  %s1425_s18 = smov 0   ;;  %s1427_s19 = smov 0  }
   0xa   :  { %s1429_s20 = smov 0   ;;  %s1431_s21 = smov 0  }
   0xb   :  { %s1433_s22 = smov 0   ;;  %s1435_s23 = smov 0  }
   0xc LB: > { %1793 = sst [smem:[#allocation15_spill]] %s1377_s22  ;;  %s1456_s24 = sadd.s32 4294967295, %s1381_s23   ;;  %s1381_s23 = sphi %s1435_s23, %s28_s23   ;;  %s1377_s22 = sphi %s1433_s22, %s1820_s22   ;;  %s1373_s21 = sphi %s1431_s21, %s1819_s21   ;;  %s1369_s20 = sphi %s1429_s20, %s1823_s20   ;;  %s1365_s19 = sphi %s1427_s19, %s1822_s19   ;;  %s1361_s18 = sphi %s1425_s18, %s1821_s18  }
   0xd   : > { %1794 = sst [smem:[#allocation16_spill]] %s1381_s23  ;;  %s1013_s25 = sadd.s32 4294967294, %s1381_s23  }
   0xe   : > { %s47_s26 = sadd.s32 1, %s1377_s22  ;;  %s58_s27 = sadd.s32 1, %s1369_s20 }
   0xf   : > { %p49_p0 = scmp.ge.s32.totalorder %s47_s26, 2  ;;  %p65_p1 = scmp.ne.s32.totalorder %s1369_s20, %s1365_s19 }
  0x10   : > { %p66_p2 = scmp.eq.s32.totalorder %s1381_s23, 0  ;;  %p71_p3 = scmp.ne.s32.totalorder %s1365_s19, %s1361_s18 }
  0x11   : > { %s1825_s26 = smov (%p49_p0, %s47_s26), 0  ;;  %p72_p5 = scmp.eq.s32.totalorder %s1456_s24, 0 }
  0x12   : > { %1795 = sst [smem:[#allocation17_spill]] %s1825_s26  ;;  %p1468_p4 = por %p66_p2, %p65_p1 }
  0x13   : > { %s51_s29 = ssub.s32 %s1377_s22, %s1825_s26  ;;  %p185_p6 = scmp.eq.s32.totalorder %s1456_s24, 1 }
  0x14   : > { %p56_p7 = scmp.eq.s32.totalorder %s51_s29, 0  ;;  %p1476_p8 = por %p72_p5, %p71_p3 }
  0x15   : > { %p1480_p9 = por %p185_p6, %p65_p1  ;;  %p191_p10 = scmp.eq.s32.totalorder %s1013_s25, 1 }
  0x16   : > { %s1797_s30 = scalar_select %p1476_p8, 1, 0 }
  0x17   : > { %s1798_s6 = scalar_select %p1480_p9, 1, 0 }
  0x18   : > { %s1485_s7 = scalar_select %p56_p7, %s1369_s20, %s58_s27  }
  0x19   : > { %p1487_p11 = por %p191_p10, %p71_p3  ;;  %p1108_p13 = scmp.lt.s32.totalorder %s1381_s23, 2 }
  0x1a   : > { %1799 = sst [smem:[#allocation18_spill]] %s1485_s7  ;;  %s1780_s9 = sand.u32 1, %s1369_s20  }
  0x1b   : > { %s1800_s8 = scalar_select %p1487_p11, 1, 0 }
  0x1c   : > { %s1496_s10 = sshll.u32 %s1780_s9, 4  ;;  %s1499_s11 = sshll.u32 %s1377_s22, 8 }
  0x1d   : > { %1801 = sst [smem:[#allocation19_spill]] %s1800_s8  ;;  %p1503_p0 = pnand %p1108_p13, %p1468_p4 }
  0x1e   : > { %s265_s13 = sand.u32 1, %s1381_s23   ;;  %s1803_s1 = sld [smem:[#allocation20_spill]] }
  0x1f   : > { %s269_s17 = scalar_lea.vmem [#allocation5], %s1496_s10  ;;  %s1519_s27 = scalar_lea.sflag [#allocation6], %s265_s13 }
  0x20   : > { %s278_s25 = sshll.u32 %s269_s17, 4  ;;  %p1525_p4 = pneg %p1503_p0  ;;  %s1516_s25 = int_to_ptr.vmem [resolvable:$true] %s278_s25 }
  0x24   : > { %s1512_s16 = scalar_lea.hbm %s1803_s1, %s1499_s11  ;;  %s1178_s17 = scalar_lea.hbm %s1803_s1, 512 }
  0x25   : > { %s1173_s28 = scalar_lea.hbm %s1512_s16, 256  ;;  %p1179_p7 = scmp.lt.u32.totalorder %s1512_s16, %s1803_s1 }
  0x26   : > { %p1174_p3 = scmp.ne.s32.totalorder %s1512_s16, %s1173_s28  ;;  %p1180_p10 = scmp.lt.u32.totalorder %s1178_s17, %s1173_s28 }
  0x27   : > { %p1182_p12 = scmp.lt.u32.totalorder %s1173_s28, %s1512_s16 }
  0x28   : > { %p1176_p5 = pnand %p1525_p4, %p1174_p3  ;;  %p1181_p13 = por %p1180_p10, %p1179_p7 }
  0x2a   : > { %p1177_p6 = pneg %p1176_p5  ;;  %p1183_p1 = por %p1182_p12, %p1181_p13 }
  0x2c   : > { %p1184_p2 = pnand %p1183_p1, %p1177_p6 }
  0x2e   : > { %1187 = shalt.err (!%p1184_p2)
}
  0x2f   : > { %s1188_s13 = scalar_lea.vmem %s1516_s25, 256  ;;  %s1383_s14 = smov [#allocation5]  }
  0x30   : > { %p1189_p3 = scmp.ne.s32.totalorder %s1516_s25, %s1188_s13  ;;  %s1193_s15 = sshll.u32 %s1383_s14, 4  ;;  %s1194_s15 = int_to_ptr.vmem [resolvable:$false] %s1193_s15 }
  0x31   : > { %s1195_s26 = scalar_lea.vmem %s1194_s15, 512  ;;  %p1196_p9 = scmp.lt.s32.totalorder %s1516_s25, %s1194_s15 }
  0x32   : > { %p1191_p5 = pnand %p1189_p3, %p1525_p4  ;;  %p1197_p8 = scmp.lt.s32.totalorder %s1195_s26, %s1188_s13 }
  0x34   : > { %p1192_p11 = pneg %p1191_p5  ;;  %p1198_p7 = por %p1197_p8, %p1196_p9 }
  0x36   : > { %p1199_p10 = pnand %p1198_p7, %p1192_p11 }
  0x38   : > { %1202 = shalt.err (!%p1199_p10)
}
  0x39   : > { %s1784_s9 = smov 128   ;;  %s1786_s28 = smov 8  }
  0x3a   : > { %1097 = dma.hbm_to_vmem [thread:$0]  (!%p1503_p0), %s1512_s16, 256, %s1516_s25, %s1519_s27, %s1784_s9, %s1784_s9, %s1786_s28  }
  0x3b   : > { %p1805_p8 = scmp.lt.s32.totalorder %s1381_s23, 3  ;;  %p1806_p9 = scmp.ge.s32.totalorder %s1381_s23, 1 }
  0x3c   : > { %s1564_s15 = scalar_lea.hbm %s1774_s0, %s1499_s11  ;;  %s245_s26 = scalar_lea.vmem [#allocation2], %s1496_s10 }
  0x3d   : > { %p1556_p11 = pnand %p1806_p9, %p1805_p8  ;;  %s255_s1 = sshll.u32 %s245_s26, 4  ;;  %s1567_s1 = int_to_ptr.vmem [resolvable:$true] %s255_s1 }
  0x3e   : > { %s1573_s9 = scalar_lea.hbm %s1776_s2, %s1499_s11  ;;  %s1808_s28 = sand.u32 1, %s1369_s20  }
  0x3f   : > { %s1807_s17 = scalar_select %p1556_p11, 1, 0 }
  0x40   : > { %s1577_s22 = scalar_lea.sflag [#allocation3], %s1808_s28  ;;  %s1203_s7 = scalar_lea.hbm %s1564_s15, 256 }
  0x41   : > { %p1204_p12 = scmp.ne.s32.totalorder %s1564_s15, %s1203_s7  ;;  %s1208_s23 = scalar_lea.hbm %s1774_s0, 512 }
  0x42   : > { %p1209_p6 = scmp.lt.u32.totalorder %s1564_s15, %s1774_s0  ;;  %p1210_p13 = scmp.lt.u32.totalorder %s1208_s23, %s1203_s7 }
  0x43   : > { %p1206_p1 = pnand %p1204_p12, %p1525_p4  ;;  %p1212_p5 = scmp.lt.u32.totalorder %s1203_s7, %s1564_s15 }
  0x44   : > { %p1211_p3 = por %p1210_p13, %p1209_p6 }
  0x45   : > { %p1207_p2 = pneg %p1206_p1 }
  0x46   : > { %p1213_p7 = por %p1212_p5, %p1211_p3 }
  0x48   : > { %p1214_p10 = pnand %p1213_p7, %p1207_p2 }
  0x4a   : > { %1217 = shalt.err (!%p1214_p10)
}
  0x4b   : > { %s1218_s11 = scalar_lea.vmem %s1567_s1, 256  ;;  %s1386_s28 = smov [#allocation2]  }
  0x4c   : > { %p1219_p8 = scmp.ne.s32.totalorder %s1567_s1, %s1218_s11  ;;  %s1223_s16 = sshll.u32 %s1386_s28, 4  ;;  %s1224_s16 = int_to_ptr.vmem [resolvable:$false] %s1223_s16 }
  0x4d   : > { %s1225_s8 = scalar_lea.vmem %s1224_s16, 512  ;;  %p1226_p1 = scmp.lt.s32.totalorder %s1567_s1, %s1224_s16 }
  0x4e   : > { %p1221_p9 = pnand %p1219_p8, %p1525_p4  ;;  %p1227_p11 = scmp.lt.s32.totalorder %s1225_s8, %s1218_s11 }
  0x50   : > { %p1222_p12 = pneg %p1221_p9  ;;  %p1228_p6 = por %p1227_p11, %p1226_p1 }
  0x52   : > { %p1229_p13 = pnand %p1228_p6, %p1222_p12 }
  0x54   : > { %1232 = shalt.err (!%p1229_p13)
}
  0x55   : > { %s1809_s23 = smov 8   ;;  %s1810_s7 = smov 128  }
  0x56   : > { %1094 = dma.hbm_to_vmem [thread:$0]  (!%p1503_p0), %s1564_s15, 256, %s1567_s1, %s1577_s22, %s1810_s7, %s1810_s7, %s1809_s23  }
  0x57   : > { %s292_s25 = scalar_lea.vmem [#allocation7], %s1496_s10  ;;  %s1233_s14 = scalar_lea.hbm %s1573_s9, 256 }
  0x58   : > { %s301_s13 = sshll.u32 %s292_s25, 4  ;;  %p1234_p11 = scmp.ne.s32.totalorder %s1573_s9, %s1233_s14  ;;  %s1605_s13 = int_to_ptr.vmem [resolvable:$true] %s301_s13 }
  0x59   : > { %s1238_s28 = scalar_lea.hbm %s1776_s2, 512  ;;  %p1239_p5 = scmp.lt.u32.totalorder %s1573_s9, %s1776_s2 }
  0x5a   : > { %p1236_p2 = pnand %p1234_p11, %p1525_p4  ;;  %p1240_p7 = scmp.lt.u32.totalorder %s1238_s28, %s1233_s14 }
  0x5b   : > { %p1242_p8 = scmp.lt.u32.totalorder %s1233_s14, %s1573_s9 }
  0x5c   : > { %p1237_p3 = pneg %p1236_p2  ;;  %p1241_p10 = por %p1240_p7, %p1239_p5 }
  0x5e   : > { %p1243_p9 = por %p1242_p8, %p1241_p10 }
  0x60   : > { %p1244_p12 = pnand %p1243_p9, %p1237_p3 }
  0x62   : > { %1247 = shalt.err (!%p1244_p12)
}
  0x63   : > { %s1248_s1 = scalar_lea.vmem %s1605_s13, 256  ;;  %s1387_s22 = smov [#allocation7]  }
  0x64   : > { %p1249_p1 = scmp.ne.s32.totalorder %s1605_s13, %s1248_s1  ;;  %s1253_s10 = sshll.u32 %s1387_s22, 4  ;;  %s1254_s10 = int_to_ptr.vmem [resolvable:$false] %s1253_s10 }
  0x65   : > { %s1255_s15 = scalar_lea.vmem %s1254_s10, 512  ;;  %p1256_p11 = scmp.lt.s32.totalorder %s1605_s13, %s1254_s10 }
  0x66   : > { %p1251_p6 = pnand %p1249_p1, %p1525_p4  ;;  %p1257_p2 = scmp.lt.s32.totalorder %s1255_s15, %s1248_s1 }
  0x68   : > { %p1252_p13 = pneg %p1251_p6  ;;  %p1258_p5 = por %p1257_p2, %p1256_p11 }
  0x6a   : > { %p1259_p7 = pnand %p1258_p5, %p1252_p13 }
  0x6c   : > { %1262 = shalt.err (!%p1259_p7)
}
  0x6d   : > { %1100 = dma.hbm_to_vmem [thread:$0]  (!%p1503_p0), %s1573_s9, 256, %s1605_s13, %s1519_s27, %s1810_s7, %s1810_s7, %s1809_s23  }
  0x6e   : > { %p1811_p4 = scmp.ne.s32.totalorder %s1807_s17, 0 }
  0x6f   : > { %s1635_s29 = sand.u32 (!%p1811_p4), 1, %s1365_s19   ;;  %p1812_p3 = scmp.ne.s32.totalorder (!%p1811_p4), %s1797_s30, 0 }
  0x70   : > { %329 = sbr.rel (%p1811_p4) target bundleno = 886 (0x376), region = 36  ;;  %s1638_s25 = sshll.u32 (!%p1811_p4), %s1635_s29, 4 }
  0x71   : > { %s332_s12 = scalar_lea.sflag (!%p1811_p4), [#allocation3], %s1635_s29  ;;  %s335_s14 = scalar_lea.vmem (!%p1811_p4), [#allocation2], %s1638_s25 }
  0x77   : > { %1344 = dma.done.wait (%p1812_p3), %s332_s12, 256  }
  0x78   : > { %1346 = vsyncadd (%p1812_p3), %s332_s12, 4294967040  ;;  %s340_s27 = sand.u32 1, %s1456_s24   ;;  %s344_s17 = scalar_lea.vmem [#allocation5], %s1638_s25 }
  0x79   : > { %s341_s9 = scalar_lea.sflag [#allocation6], %s340_s27 }
  0x7a   : > { %1348 = dma.done.wait (%p1812_p3), %s341_s9, 512  }
  0x7b   : > { %1350 = vsyncadd (%p1812_p3), %s341_s9, 4294966784  ;;  %v1388_v0 = vmov 0.0   ;;  %vm1389_vm0 = vmmov 0   ;;  %vm433_vm1 = vcmask 261120   ;;  %v431_v1 = vld [vmem:[%s344_s17] sm:$0xff]  ;;  %v432_v3 = vld [vmem:[%s344_s17 + $0x8] sm:$0xff] }
  0x7c   : > { %1061 = vmatprep.subr.mxu0 %v1388_v0  ;;  %1063 = vmatprep.mubr.msk.f32.mxu0 %vm1389_vm0, %v1388_v0  ;;  %v427_v2 = vld [vmem:[%s335_s14] sm:$0xff]  ;;  %v428_v5 = vld [vmem:[%s335_s14 + $0x8] sm:$0xff]  ;;  %p411_p0 = scmp.lt.s32.totalorder %s1373_s21, 1  ;;  %v1390_v9 = vmov 0   ;;  %vm598_vm6 = vcmask 64512   ;;  %s353_s26 = scalar_lea.vmem [#allocation7], %s1638_s25 }
  0x7d   : > { %1066 = vmatprep.subr.mxu1 %v1388_v0  ;;  %1068 = vmatprep.mubr.msk.f32.mxu1 %vm1389_vm0, %v1388_v0  ;;  %v429_v4 = vmul.f32 0.17677669, %v427_v2  ;;  %v430_v6 = vmul.f32 0.17677669, %v428_v5  ;;  %v623_v32 = vld [vmem:[%s353_s26] sm:$0xff]  ;;  %v624_v33 = vld [vmem:[%s353_s26 + $0x8] sm:$0xff] }
  0x7e   : > { %1062 = vmatpush3.xpose.msk.msra.mxu0 %vm433_vm1, %v431_v1  ;;  %1067 = vmatpush3.xpose.msk.msra.mxu1 %vm433_vm1, %v432_v3  ;;  %s412_s24 = scalar_select %p411_p0, %s1373_s21, 1 }
  0x7f   : > { %1071 = vmatprep.subr.mxu0 %v1388_v0  ;;  %1076 = vmatprep.subr.mxu1 %v1388_v0  ;;  %s406_s11 = scalar_lea.vmem [#allocation9], %s1638_s25  ;;  %s1051_s28 = sshll.u32 %s1373_s21, 8 }
  0x80   : > { %s1050_s30 = sshll.u32 %s412_s24, 2  ;;  %s814_s16 = sshll.u32 %s406_s11, 4  ;;  %s1683_s16 = int_to_ptr.vmem [resolvable:$true] %s814_s16 }
  0x81   : > { %1064 = vmatmul.mubr.msk.f32.vlgmr.msra.gmra.mrb[0].mxu0 %vm433_vm1, %v429_v4  ;;  %1069 = vmatmul.mubr.msk.f32.vlgmr.msra.gmra.mrb[0].mxu1 %vm433_vm1, %v430_v6  ;;  %s421_s13 = scalar_lea.vmem %s1777_s3, %s1050_s30  ;;  %s1681_s22 = scalar_lea.hbm %s1779_s5, %s1051_s28 }
  0x82   : > { %1073 = vmatprep.mubr.msk.f32.mxu0 %vm1389_vm0, %v1388_v0  ;;  %1078 = vmatprep.mubr.msk.f32.mxu1 %vm1389_vm0, %v1388_v0  ;;  %v586_v7 = vld [vmem:[%s421_s13] sm:$0x3]  ;;  %v587_v8 = vld [vmem:[%s421_s13 + $0x2] sm:$0x3]  ;;  %s779_s10 = scalar_lea.sflag [#allocation10], %s1635_s29  ;;  %s1263_s15 = scalar_lea.vmem %s1683_s16, 256 }
  0x83   : > { %vm588_vm2 = vnez %v586_v7  ;;  %vm589_vm3 = vnez %v587_v8  ;;  %1072 = vmatpush3.msra.mxu0 %v623_v32  ;;  %1077 = vmatpush3.msra.mxu1 %v624_v33  ;;  %p1264_p10 = scmp.ne.s32.totalorder %s1683_s16, %s1263_s15  ;;  %p1813_p8 = scmp.ne.s32.totalorder %s1798_s6, 0 }
  0x84   : > { %v590_v10 = vsel %vm588_vm2, 16843009, %v1390_v9  ;;  %v591_v11 = vsel %vm589_vm3, 16843009, %v1390_v9  ;;  %s1391_s12 = smov [#allocation9]  }
  0x85   : > { %v592_v12 = vunpack.c.0.s8 %v590_v10  ;;  %v593_v13 = vunpack.c.0.s8 %v591_v11  ;;  %p1265_p9 = pnand %p1264_p10, %p1813_p8  ;;  %s1267_s14 = sshll.u32 %s1391_s12, 4  ;;  %s1268_s14 = int_to_ptr.vmem [resolvable:$false] %s1267_s14 }
  0x86   : > { %s1269_s27 = scalar_lea.vmem %s1268_s14, 512  ;;  %p1270_p1 = scmp.lt.s32.totalorder %s1683_s16, %s1268_s14 }
  0x87   : > { %vm594_vm4 = vcmp.ne.s32.totalorder %v592_v12, 0  ;;  %vm595_vm5 = vcmp.ne.s32.totalorder %v593_v13, 0  ;;  %p1266_p12 = pneg %p1265_p9  ;;  %p1271_p6 = scmp.lt.s32.totalorder %s1269_s27, %s1263_s15 }
  0x89   : > { %p1272_p13 = por %p1271_p6, %p1270_p1 }
  0x8b   : > { %p1273_p11 = pnand %p1272_p13, %p1266_p12 }
 0x154   : > { %v506_v14 = vpop.f32.mrb[0].mxu0  ;;  %v582_v15 = vpop.f32.mrb[0].mxu1 }
 0x155   : > { %v596_v16 = vsel %vm594_vm4, -1e+09, %v506_v14  ;;  %v1065_v17 = vpop.f32.mrb[1].mxu0  ;;  %v597_v18 = vsel %vm595_vm5, -1e+09, %v582_v15  ;;  %v1070_v19 = vpop.f32.mrb[1].mxu1 }
 0x156   : > { %v599_v20 = vsel %vm598_vm6, %v596_v16, -inf  ;;  %v602_v21 = vsel %vm598_vm6, %v597_v18, -inf }
 0x157   : > { %600 = vmax.xlane.f32.xlu0 %v599_v20 }
 0x15b   : > { %603 = vmax.xlane.f32.xlu0 %v602_v21 }
 0x1e4   : > { %v601_v22 = vpop.xlane.xlu0 %600 }
 0x1e5   : > { %v605_v23 = vsub.f32 %v596_v16, %v601_v22 }
 0x1e7   : > { %v607_v24 = vmul.f32 1.442695, %v605_v23 }
 0x1e8   : > { %v604_v25 = vpop.xlane.xlu0 %603 }
 0x1e9   : > { %1165 = vpow2.f32 %v607_v24  ;;  %v606_v26 = vsub.f32 %v597_v18, %v604_v25 }
 0x1eb   : > { %v609_v27 = vmul.f32 1.442695, %v606_v26 }
 0x1ed   : > { %1167 = vpow2.f32 %v609_v27 }
 0x1f3   : > { %v1166_v28 = vpop.eup %1165 }
 0x1f4   : > { %v611_v29 = vsel %vm598_vm6, %v1166_v28, 0.0 }
 0x1f5   : > { %612 = vadd.xlane.f32.xlu1 %v611_v29 }
 0x1f7   : > { %v1168_v30 = vpop.eup %1167 }
 0x1f8   : > { %v614_v31 = vsel %vm598_vm6, %v1168_v30, 0.0 }
 0x1f9   : > { %615 = vadd.xlane.f32.xlu1 %v614_v31 }
 0x282   : > { %v613_v34 = vpop.xlane.xlu1 %612 }
 0x283   : > { %1169 = vrcp.f32 %v613_v34 }
 0x286   : > { %v616_v35 = vpop.xlane.xlu1 %615 }
 0x287   : > { %1171 = vrcp.f32 %v616_v35 }
 0x28d   : > { %v1170_v36 = vpop.eup %1169 }
 0x28e   : > { %v619_v37 = vmul.f32 %v1170_v36, %v1166_v28 }
 0x290   : > { %1074 = vmatmul.mubr.msk.f32.vlgmr.msra.gmra.mrb[2].mxu0 %vm598_vm6, %v619_v37  ;;  %621 = vst.msk [vmem:[%s406_s11] sm:$0xff] %vm598_vm6, %v619_v37 }
 0x291   : > { %v1172_v38 = vpop.eup %1171 }
 0x292   : > { %v620_v39 = vmul.f32 %v1172_v38, %v1168_v30 }
 0x294   : > { %1079 = vmatmul.mubr.msk.f32.vlgmr.msra.gmra.mrb[2].mxu1 %vm598_vm6, %v620_v39  ;;  %622 = vst.msk [vmem:[%s406_s11 + $0x8] sm:$0xff] %vm598_vm6, %v620_v39 }
 0x295   : > { %1276 = shalt.err (!%p1273_p11)
}
 0x296   : > { %s1277_s9 = scalar_lea.hbm %s1681_s22, 256  ;;  %s1281_s30 = scalar_lea.hbm %s1779_s5, 512 }
 0x297   : > { %p1278_p2 = scmp.ne.s32.totalorder %s1681_s22, %s1277_s9  ;;  %p1282_p4 = scmp.lt.u32.totalorder %s1681_s22, %s1779_s5 }
 0x298   : > { %p1283_p3 = scmp.lt.u32.totalorder %s1281_s30, %s1277_s9  ;;  %p1285_p10 = scmp.lt.u32.totalorder %s1277_s9, %s1681_s22 }
 0x299   : > { %p1279_p5 = pnand %p1278_p2, %p1813_p8 }
 0x29a   : > { %p1284_p0 = por %p1283_p3, %p1282_p4 }
 0x29b   : > { %p1280_p7 = pneg %p1279_p5 }
 0x29c   : > { %p1286_p9 = por %p1285_p10, %p1284_p0 }
 0x29e   : > { %p1287_p12 = pnand %p1286_p9, %p1280_p7 }
 0x2a0   : > { %1290 = shalt.err (!%p1287_p12)
}
 0x2a1   : > { %s1392_s13 = smov 128   ;;  %s1393_s26 = smov 8  }
 0x2a2   : > { %1088 = dma.vmem_to_hbm [thread:$0]  (%p1813_p8), %s1683_s16, 256, %s1681_s22, %s779_s10, %s1392_s13, %s1392_s13, %s1393_s26  }
 0x2a3   : > { %s399_s11 = scalar_lea.vmem [#allocation8], %s1638_s25  ;;  %s1721_s12 = scalar_lea.hbm %s1778_s4, %s1051_s28 }
 0x2a4   : > { %s795_s8 = sshll.u32 %s399_s11, 4  ;;  %s774_s25 = scalar_lea.sflag [#allocation4], %s1635_s29  ;;  %s1714_s8 = int_to_ptr.vmem [resolvable:$true] %s795_s8 }
 0x2a5   : > { %s1291_s16 = scalar_lea.vmem %s1714_s8, 256  ;;  %s1394_s22 = smov [#allocation8]  }
 0x2a6   : > { %p1292_p1 = scmp.ne.s32.totalorder %s1714_s8, %s1291_s16  ;;  %s1295_s21 = sshll.u32 %s1394_s22, 4  ;;  %s1296_s21 = int_to_ptr.vmem [resolvable:$false] %s1295_s21 }
 0x2a7   : > { %s1297_s10 = scalar_lea.vmem %s1296_s21, 512  ;;  %p1298_p11 = scmp.lt.s32.totalorder %s1714_s8, %s1296_s21 }
 0x2a8   : > { %p1293_p6 = pnand %p1292_p1, %p1813_p8  ;;  %p1299_p2 = scmp.lt.s32.totalorder %s1297_s10, %s1291_s16 }
 0x2aa   : > { %p1294_p13 = pneg %p1293_p6  ;;  %p1300_p5 = por %p1299_p2, %p1298_p11 }
 0x2ac   : > { %p1301_p7 = pnand %p1300_p5, %p1294_p13 }
 0x363   : > { %v694_v40 = vpop.f32.mrb[2].mxu0 }
 0x364   : > { %771 = vst.msk [vmem:[%s399_s11] sm:$0xff] %vm433_vm1, %v694_v40  ;;  %v1075_v41 = vpop.f32.mrb[3].mxu0 }
 0x367   : > { %v767_v42 = vpop.f32.mrb[2].mxu1 }
 0x368   : > { %772 = vst.msk [vmem:[%s399_s11 + $0x8] sm:$0xff] %vm433_vm1, %v767_v42  ;;  %v1080_v43 = vpop.f32.mrb[3].mxu1 }
 0x369   : > { %1304 = shalt.err (!%p1301_p7)
}
 0x36a   : > { %s1305_s28 = scalar_lea.hbm %s1721_s12, 256  ;;  %s1309_s9 = scalar_lea.hbm %s1778_s4, 512 }
 0x36b   : > { %p1306_p4 = scmp.ne.s32.totalorder %s1721_s12, %s1305_s28  ;;  %p1310_p10 = scmp.lt.u32.totalorder %s1721_s12, %s1778_s4 }
 0x36c   : > { %p1311_p9 = scmp.lt.u32.totalorder %s1309_s9, %s1305_s28  ;;  %p1313_p1 = scmp.lt.u32.totalorder %s1305_s28, %s1721_s12 }
 0x36d   : > { %p1307_p3 = pnand %p1306_p4, %p1813_p8 }
 0x36e   : > { %p1312_p12 = por %p1311_p9, %p1310_p10 }
 0x36f   : > { %p1308_p0 = pneg %p1307_p3 }
 0x370   : > { %p1314_p6 = por %p1313_p1, %p1312_p12 }
 0x372   : > { %p1315_p13 = pnand %p1314_p6, %p1308_p0 }
 0x374   : > { %1318 = shalt.err (!%p1315_p13)
}
 0x375   : > { %1087 = dma.vmem_to_hbm [thread:$0]  (%p1813_p8), %s1714_s8, 256, %s1721_s12, %s774_s25, %s1392_s13, %s1392_s13, %s1393_s26  }
 0x376 PF: > { %s1814_s30 = sld [smem:[#allocation19_spill]]  ;;  %s1815_s23 = sld [smem:[#allocation16_spill]] }
 0x377   : > { %s829_s7 = sand.u32 1, %s1361_s18  }
 0x378   : > { %s830_s11 = scalar_lea.sflag [#allocation4], %s829_s7 }
 0x37c   : > { %p1816_p11 = scmp.ne.s32.totalorder %s1814_s30, 0  ;;  %p1817_p2 = scmp.ge.s32.totalorder %s1815_s23, 2 }
 0x37e   : > { %p1102_p5 = pnand %p1817_p2, %p1816_p11 }
 0x380   : > { %1352 = dma.done.wait (!%p1102_p5), %s830_s11, 256  }
 0x381   : > { %1354 = vsyncadd (!%p1102_p5), %s830_s11, 4294967040  ;;  %s839_s6 = scalar_lea.sflag [#allocation10], %s829_s7 }
 0x382   : > { %1356 = dma.done.wait (!%p1102_p5), %s839_s6, 256  }
 0x383   : > { %1358 = vsyncadd (!%p1102_p5), %s839_s6, 4294967040  ;;  %s28_s23 = sadd.s32 1, %s1815_s23   ;;  %s1818_s29 = sld [smem:[#allocation18_spill]] }
 0x384   : > { %p25_p7 = scmp.ge.s32.totalorder %s28_s23, 4   ;;  %s1819_s21 = sld [smem:[#allocation15_spill]] }
 0x385   : > { %s1820_s22 = sld [smem:[#allocation17_spill]]  ;;  %s1821_s18 = smov %s1365_s19 }
 0x386   : > { %s1822_s19 = smov %s1369_s20  ;;  %27 = sbr.rel (!%p25_p7) target bundleno = 12 (0xc), region = 125 }
 0x389   : > { %s1823_s20 = smov %s1818_s29 }
 0x38d   :  { %844 = vsyncpa [#allocation3], 1 }
 0x38e   :  { %846 = vsyncpa [#allocation3 + $0x1], 1 }
 0x38f   :  { %847 = vsyncpa [#allocation6], 1 }
 0x390   :  { %849 = vsyncpa [#allocation6 + $0x1], 1 }
 0x391   :  { %850 = vsyncpa [#allocation4], 1 }
 0x392   :  { %852 = vsyncpa [#allocation4 + $0x1], 1 }
 0x393   :  { %853 = vsyncpa [#allocation10], 1 }
 0x394   :  { %855 = vsyncpa [#allocation10 + $0x1], 1 }

</bundles_post_ra>
